<compile_context>
chip_gen: v7x
topology: tpu7x:2x2x1
jax: 0.10.0
libtpu: 0.0.40
codegen_flags: <defaults>
</compile_context>

<pallas_src>
import math
import jax
import jax.numpy as jnp
from jax import lax
from jax.experimental import pallas as pl
from jax.experimental.pallas import tpu as pltpu

SEQ = 8          # L
BATCH = 2        # N
DIM = 32         # E
HEADS = 4        # H
HEAD_DIM = DIM // HEADS
EPS = 1e-5
ROWS = SEQ * BATCH          # fused M dimension (L*N) = 16

# rows of the packed parameter slab
_BO, _G1, _BE1, _B2, _G2, _BE2 = range(6)


def _transformer_block_kernel(
        x_ref,                 # (ROWS, E)        fused (L*N, E) slab
        wqkv_ref, bqkv_ref,    # (E, 3E), (1, 3E) fused QKV weight/bias (q-part pre-scaled)
        wo_ref,                # (E, E)           out_proj_w.T
        w1_ref, b1_ref,        # (E, 2E), (1, 2E) MLP layer 1 (pre-transposed)
        w2_ref,                # (2E, E)          MLP layer 2 (pre-transposed)
        slab_ref,              # (6, E)           {bo, g1, be1, b2, g2, be2}
        mask_ref,              # (ROWS, ROWS)     additive cross-batch mask (0 / -1e30)
        o_ref):                # (ROWS, E)
    f32 = jnp.float32

    x = x_ref[...]                                                     # (16, 32)
    mask = mask_ref[...]                                               # (16, 16)

    # ---- fused QKV projection: one lane-dense (16,32)x(32,96) MXU push ----
    qkv = jnp.dot(x, wqkv_ref[...], preferred_element_type=f32) + bqkv_ref[...]  # (16, 96)

    # ---- per-head attention: static lane slices, unrolled over H ----
    ctx_parts = []
    for h in range(HEADS):
        lo = h * HEAD_DIM
        qh = qkv[:, lo:lo + HEAD_DIM]                                  # (16, 8), already scaled
        kh = qkv[:, DIM + lo:DIM + lo + HEAD_DIM]                      # (16, 8)
        vh = qkv[:, 2 * DIM + lo:2 * DIM + lo + HEAD_DIM]              # (16, 8)

        s = lax.dot_general(qh, kh, (((1,), (1,)), ((), ())),
                            preferred_element_type=f32)                # (16, 16)
        s = s + mask                                                   # mask cross-batch pairs
        s = s - jnp.max(s, axis=-1, keepdims=True)
        p = jnp.exp(s)
        p = p * pl.reciprocal(jnp.sum(p, axis=-1, keepdims=True), approx=True)

        ctx_parts.append(jnp.dot(p, vh, preferred_element_type=f32))   # (16, 8)

    ctx = jnp.concatenate(ctx_parts, axis=-1)                          # (16, 32), lane-dense

    # ---- output projection: single (16,32)x(32,32) matmul (head contraction in MXU) ----
    att = jnp.dot(ctx, wo_ref[...], preferred_element_type=f32) + slab_ref[_BO:_BO + 1, :]

    # ---- x1 = norm1(x + attention) ----
    x1 = x + att
    mu1 = jnp.mean(x1, axis=-1, keepdims=True)
    var1 = jnp.mean((x1 - mu1) ** 2, axis=-1, keepdims=True)
    x1 = ((x1 - mu1) * lax.rsqrt(var1 + EPS)
          * slab_ref[_G1:_G1 + 1, :] + slab_ref[_BE1:_BE1 + 1, :])

    # ---- MLP: Linear(E, 2E) -> ReLU -> Linear(2E, E), fused M = L*N ----
    hdn = jnp.dot(x1, w1_ref[...], preferred_element_type=f32) + b1_ref[...]
    hdn = jnp.maximum(hdn, 0.0)
    hdn = jnp.dot(hdn, w2_ref[...], preferred_element_type=f32) + slab_ref[_B2:_B2 + 1, :]

    # ---- out = norm2(x1 + mlp(x1)) ----
    x2 = x1 + hdn
    mu2 = jnp.mean(x2, axis=-1, keepdims=True)
    var2 = jnp.mean((x2 - mu2) ** 2, axis=-1, keepdims=True)
    o_ref[...] = ((x2 - mu2) * lax.rsqrt(var2 + EPS)
                  * slab_ref[_G2:_G2 + 1, :] + slab_ref[_BE2:_BE2 + 1, :])


def transformer_block(x_lne, params):
    """x_lne: (L, N, E) seq-first, like the PyTorch module. Returns (L, N, E)."""
    L, N, E = x_lne.shape
    rows = L * N
    scale = 1.0 / math.sqrt(HEAD_DIM)

    # Fused (L*N, E) slab: free contiguous reshape (NO transpose in the wrapper).
    x_flat = x_lne.reshape(rows, E).astype(jnp.float32)

    w_in = params["in_proj_w"]                         # (3E, E)  torch: [Wq; Wk; Wv]
    b_in = params["in_proj_b"]                         # (3E,)

    # Fused (E, 3E) QKV weight; fold the 1/sqrt(Dh) scale into the q columns (free, host-side).
    w_qkv = jnp.concatenate(
        [w_in[0 * E:1 * E].T * scale, w_in[1 * E:2 * E].T, w_in[2 * E:3 * E].T], axis=1)
    b_qkv = jnp.concatenate(
        [b_in[0 * E:1 * E] * scale, b_in[1 * E:2 * E], b_in[2 * E:3 * E]]).reshape(1, 3 * E)

    wo = params["out_proj_w"].T                        # (E, E)
    w1 = params["mlp_w1"].T                            # (E, 2E)
    b1 = params["mlp_b1"].reshape(1, 2 * E)
    w2 = params["mlp_w2"].T                            # (2E, E)

    # One stacked (6, E) slab for the remaining per-feature vectors.
    slab = jnp.stack([
        params["out_proj_b"],                          # _BO
        params["norm1_g"], params["norm1_b"],          # _G1, _BE1
        params["mlp_b2"],                              # _B2
        params["norm2_g"], params["norm2_b"],          # _G2, _BE2
    ], axis=0).astype(jnp.float32)

    # Precomputed additive cross-batch mask over the fused row axis.
    r = jnp.arange(rows)
    same_batch = (r[:, None] % N) == (r[None, :] % N)
    mask = jnp.where(same_batch, 0.0, -1e30).astype(jnp.float32)

    args = (x_flat, w_qkv, b_qkv, wo, w1, b1, w2, slab, mask)

    vmem = pl.BlockSpec(memory_space=pltpu.MemorySpace.VMEM)
    out_flat = pl.pallas_call(
        _transformer_block_kernel,
        out_shape=jax.ShapeDtypeStruct((rows, E), jnp.float32),
        in_specs=[vmem] * len(args),
        out_specs=vmem,
    )(*args)                                           # single grid step (grid=())
    # TODO(synk): if SEQ*BATCH/DIM grow, add a "parallel" grid over the fused row axis
    # (v7x: 2 TCs, 64 MiB VMEM/TC) instead of the everything-resident grid=() design.

    # Free contiguous reshape back to the PyTorch (L, N, E) layout.
    return out_flat.reshape(L, N, E)


# ---------------------- pure-JAX reference (for verification) ----------------------
def reference(x_lne, params):
    E = DIM
    x = jnp.transpose(x_lne, (1, 0, 2)).astype(jnp.float32)       # (N, L, E)
    qkv = x @ params["in_proj_w"].T + params["in_proj_b"]
    q, k, v = qkv[..., :E], qkv[..., E:2 * E], qkv[..., 2 * E:]

    def split(t):   # (N, L, E) -> (N, H, L, Dh)
        N, L, _ = t.shape
        return jnp.transpose(t.reshape(N, L, HEADS, HEAD_DIM), (0, 2, 1, 3))

    qh, kh, vh = split(q), split(k), split(v)
    s = jnp.einsum("nhld,nhmd->nhlm", qh, kh) / math.sqrt(HEAD_DIM)
    p = jax.nn.softmax(s, axis=-1)
    o = jnp.einsum("nhlm,nhmd->nhld", p, vh)
    N, _, L, _ = o.shape
    o = jnp.transpose(o, (0, 2, 1, 3)).reshape(N, L, E)
    att = o @ params["out_proj_w"].T + params["out_proj_b"]

    def ln(t, g, b):
        mu = jnp.mean(t, -1, keepdims=True)
        var = jnp.mean((t - mu) ** 2, -1, keepdims=True)
        return (t - mu) * jax.lax.rsqrt(var + EPS) * g + b

    x1 = ln(x + att, params["norm1_g"], params["norm1_b"])
    h = jnp.maximum(x1 @ params["mlp_w1"].T + params["mlp_b1"], 0.0)
    h = h @ params["mlp_w2"].T + params["mlp_b2"]
    x2 = ln(x1 + h, params["norm2_g"], params["norm2_b"])
    return jnp.transpose(x2, (1, 0, 2))


def init_params(key):
    ks = jax.random.split(key, 8)
    E = DIM
    return {
        "in_proj_w": 0.1 * jax.random.normal(ks[0], (3 * E, E), jnp.float32),
        "in_proj_b": 0.1 * jax.random.normal(ks[1], (3 * E,), jnp.float32),
        "out_proj_w": 0.1 * jax.random.normal(ks[2], (E, E), jnp.float32),
        "out_proj_b": 0.1 * jax.random.normal(ks[3], (E,), jnp.float32),
        "norm1_g": jnp.ones((E,), jnp.float32),
        "norm1_b": jnp.zeros((E,), jnp.float32),
        "mlp_w1": 0.1 * jax.random.normal(ks[4], (2 * E, E), jnp.float32),
        "mlp_b1": 0.1 * jax.random.normal(ks[5], (2 * E,), jnp.float32),
        "mlp_w2": 0.1 * jax.random.normal(ks[6], (E, 2 * E), jnp.float32),
        "mlp_b2": 0.1 * jax.random.normal(ks[7], (E,), jnp.float32),
        "norm2_g": jnp.ones((E,), jnp.float32),
        "norm2_b": jnp.zeros((E,), jnp.float32),
    }


if __name__ == "__main__":
    key = jax.random.PRNGKey(0)
    kx, kp = jax.random.split(key)
    # x in PyTorch layout (seq, batch, dim) = (L, N, E)
    x = jax.random.normal(kx, (SEQ, BATCH, DIM), jnp.float32)
    params = init_params(kp)

    out = transformer_block(x, params)
    out = jax.block_until_ready(out)

    ref = reference(x, params)
    assert out.shape == (SEQ, BATCH, DIM)
    # tolerance leaves headroom for the approx (EUP) reciprocal in the softmax
    assert jnp.allclose(out, ref, atol=1e-2, rtol=1e-2), "mismatch vs reference"
    print("KERNEL_OK")
</pallas_src>

<mosaic_0001>
module attributes {stable_mosaic.version = 11 : i64} {
  func.func @_transformer_block_kernel(%arg0: memref<16x32xf32, #tpu.memory_space<vmem>>, %arg1: memref<32x96xf32, #tpu.memory_space<vmem>>, %arg2: memref<1x96xf32, #tpu.memory_space<vmem>>, %arg3: memref<32x32xf32, #tpu.memory_space<vmem>>, %arg4: memref<32x64xf32, #tpu.memory_space<vmem>>, %arg5: memref<1x64xf32, #tpu.memory_space<vmem>>, %arg6: memref<64x32xf32, #tpu.memory_space<vmem>>, %arg7: memref<6x32xf32, #tpu.memory_space<vmem>>, %arg8: memref<16x16xf32, #tpu.memory_space<vmem>>, %arg9: memref<16x32xf32, #tpu.memory_space<vmem>>) attributes {dimension_semantics = [], scalar_prefetch = 0 : i64, scratch_operands = 0 : i64, tpu.core_type = #tpu.core_type<tc>} {
    %c0 = arith.constant 0 : index
    %c0_0 = arith.constant 0 : index
    %0 = vector.load %arg0[%c0, %c0_0] : memref<16x32xf32, #tpu.memory_space<vmem>>, vector<16x32xf32>
    %c0_1 = arith.constant 0 : index
    %c0_2 = arith.constant 0 : index
    %1 = vector.load %arg8[%c0_1, %c0_2] : memref<16x16xf32, #tpu.memory_space<vmem>>, vector<16x16xf32>
    %c0_3 = arith.constant 0 : index
    %c0_4 = arith.constant 0 : index
    %2 = vector.load %arg1[%c0_3, %c0_4] : memref<32x96xf32, #tpu.memory_space<vmem>>, vector<32x96xf32>
    %cst = arith.constant dense<0.000000e+00> : vector<16x96xf32>
    %3 = tpu.matmul %0, %2, %cst {dimension_numbers = #tpu.dot_dimension_numbers<[1], [0], [0], [1], [0, 0, 1, 1], [], []>} : vector<16x32xf32>, vector<32x96xf32>, vector<16x96xf32> -> vector<16x96xf32>
    %c0_5 = arith.constant 0 : index
    %c0_6 = arith.constant 0 : index
    %4 = vector.load %arg2[%c0_5, %c0_6] : memref<1x96xf32, #tpu.memory_space<vmem>>, vector<1x96xf32>
    %5 = vector.broadcast %4 : vector<1x96xf32> to vector<16x96xf32>
    %6 = arith.addf %3, %5 : vector<16x96xf32>
    %7 = vector.extract_strided_slice %6 {offsets = [0, 0], sizes = [16, 8], strides = [1, 1]} : vector<16x96xf32> to vector<16x8xf32>
    %8 = vector.extract_strided_slice %6 {offsets = [0, 32], sizes = [16, 8], strides = [1, 1]} : vector<16x96xf32> to vector<16x8xf32>
    %9 = vector.extract_strided_slice %6 {offsets = [0, 64], sizes = [16, 8], strides = [1, 1]} : vector<16x96xf32> to vector<16x8xf32>
    %cst_7 = arith.constant dense<0.000000e+00> : vector<16x16xf32>
    %10 = tpu.matmul %7, %8, %cst_7 {dimension_numbers = #tpu.dot_dimension_numbers<[1], [1], [0], [0], [0, 0, 1, 0], [], []>} : vector<16x8xf32>, vector<16x8xf32>, vector<16x16xf32> -> vector<16x16xf32>
    %11 = arith.addf %10, %1 : vector<16x16xf32>
    %cst_8 = arith.constant dense<0xFF800000> : vector<16xf32>
    %12 = vector.multi_reduction <maximumf>, %11, %cst_8 [1] : vector<16x16xf32> to vector<16xf32>
    %13 = vector.shape_cast %12 : vector<16xf32> to vector<16x1xf32>
    %14 = vector.broadcast %13 : vector<16x1xf32> to vector<16x16xf32>
    %15 = arith.subf %11, %14 : vector<16x16xf32>
    %16 = math.exp %15 : vector<16x16xf32>
    %cst_9 = arith.constant dense<0.000000e+00> : vector<16xf32>
    %17 = vector.multi_reduction <add>, %16, %cst_9 [1] : vector<16x16xf32> to vector<16xf32>
    %18 = vector.shape_cast %17 : vector<16xf32> to vector<16x1xf32>
    %19 = tpu.reciprocal %18 {approx = true} : vector<16x1xf32> -> vector<16x1xf32>
    %20 = vector.broadcast %19 : vector<16x1xf32> to vector<16x16xf32>
    %21 = arith.mulf %16, %20 : vector<16x16xf32>
    %cst_10 = arith.constant dense<0.000000e+00> : vector<16x8xf32>
    %22 = tpu.matmul %21, %9, %cst_10 {dimension_numbers = #tpu.dot_dimension_numbers<[1], [0], [0], [1], [0, 0, 1, 1], [], []>} : vector<16x16xf32>, vector<16x8xf32>, vector<16x8xf32> -> vector<16x8xf32>
    %23 = vector.extract_strided_slice %6 {offsets = [0, 8], sizes = [16, 8], strides = [1, 1]} : vector<16x96xf32> to vector<16x8xf32>
    %24 = vector.extract_strided_slice %6 {offsets = [0, 40], sizes = [16, 8], strides = [1, 1]} : vector<16x96xf32> to vector<16x8xf32>
    %25 = vector.extract_strided_slice %6 {offsets = [0, 72], sizes = [16, 8], strides = [1, 1]} : vector<16x96xf32> to vector<16x8xf32>
    %cst_11 = arith.constant dense<0.000000e+00> : vector<16x16xf32>
    %26 = tpu.matmul %23, %24, %cst_11 {dimension_numbers = #tpu.dot_dimension_numbers<[1], [1], [0], [0], [0, 0, 1, 0], [], []>} : vector<16x8xf32>, vector<16x8xf32>, vector<16x16xf32> -> vector<16x16xf32>
    %27 = arith.addf %26, %1 : vector<16x16xf32>
    %cst_12 = arith.constant dense<0xFF800000> : vector<16xf32>
    %28 = vector.multi_reduction <maximumf>, %27, %cst_12 [1] : vector<16x16xf32> to vector<16xf32>
    %29 = vector.shape_cast %28 : vector<16xf32> to vector<16x1xf32>
    %30 = vector.broadcast %29 : vector<16x1xf32> to vector<16x16xf32>
    %31 = arith.subf %27, %30 : vector<16x16xf32>
    %32 = math.exp %31 : vector<16x16xf32>
    %cst_13 = arith.constant dense<0.000000e+00> : vector<16xf32>
    %33 = vector.multi_reduction <add>, %32, %cst_13 [1] : vector<16x16xf32> to vector<16xf32>
    %34 = vector.shape_cast %33 : vector<16xf32> to vector<16x1xf32>
    %35 = tpu.reciprocal %34 {approx = true} : vector<16x1xf32> -> vector<16x1xf32>
    %36 = vector.broadcast %35 : vector<16x1xf32> to vector<16x16xf32>
    %37 = arith.mulf %32, %36 : vector<16x16xf32>
    %cst_14 = arith.constant dense<0.000000e+00> : vector<16x8xf32>
    %38 = tpu.matmul %37, %25, %cst_14 {dimension_numbers = #tpu.dot_dimension_numbers<[1], [0], [0], [1], [0, 0, 1, 1], [], []>} : vector<16x16xf32>, vector<16x8xf32>, vector<16x8xf32> -> vector<16x8xf32>
    %39 = vector.extract_strided_slice %6 {offsets = [0, 16], sizes = [16, 8], strides = [1, 1]} : vector<16x96xf32> to vector<16x8xf32>
    %40 = vector.extract_strided_slice %6 {offsets = [0, 48], sizes = [16, 8], strides = [1, 1]} : vector<16x96xf32> to vector<16x8xf32>
    %41 = vector.extract_strided_slice %6 {offsets = [0, 80], sizes = [16, 8], strides = [1, 1]} : vector<16x96xf32> to vector<16x8xf32>
    %cst_15 = arith.constant dense<0.000000e+00> : vector<16x16xf32>
    %42 = tpu.matmul %39, %40, %cst_15 {dimension_numbers = #tpu.dot_dimension_numbers<[1], [1], [0], [0], [0, 0, 1, 0], [], []>} : vector<16x8xf32>, vector<16x8xf32>, vector<16x16xf32> -> vector<16x16xf32>
    %43 = arith.addf %42, %1 : vector<16x16xf32>
    %cst_16 = arith.constant dense<0xFF800000> : vector<16xf32>
    %44 = vector.multi_reduction <maximumf>, %43, %cst_16 [1] : vector<16x16xf32> to vector<16xf32>
    %45 = vector.shape_cast %44 : vector<16xf32> to vector<16x1xf32>
    %46 = vector.broadcast %45 : vector<16x1xf32> to vector<16x16xf32>
    %47 = arith.subf %43, %46 : vector<16x16xf32>
    %48 = math.exp %47 : vector<16x16xf32>
    %cst_17 = arith.constant dense<0.000000e+00> : vector<16xf32>
    %49 = vector.multi_reduction <add>, %48, %cst_17 [1] : vector<16x16xf32> to vector<16xf32>
    %50 = vector.shape_cast %49 : vector<16xf32> to vector<16x1xf32>
    %51 = tpu.reciprocal %50 {approx = true} : vector<16x1xf32> -> vector<16x1xf32>
    %52 = vector.broadcast %51 : vector<16x1xf32> to vector<16x16xf32>
    %53 = arith.mulf %48, %52 : vector<16x16xf32>
    %cst_18 = arith.constant dense<0.000000e+00> : vector<16x8xf32>
    %54 = tpu.matmul %53, %41, %cst_18 {dimension_numbers = #tpu.dot_dimension_numbers<[1], [0], [0], [1], [0, 0, 1, 1], [], []>} : vector<16x16xf32>, vector<16x8xf32>, vector<16x8xf32> -> vector<16x8xf32>
    %55 = vector.extract_strided_slice %6 {offsets = [0, 24], sizes = [16, 8], strides = [1, 1]} : vector<16x96xf32> to vector<16x8xf32>
    %56 = vector.extract_strided_slice %6 {offsets = [0, 56], sizes = [16, 8], strides = [1, 1]} : vector<16x96xf32> to vector<16x8xf32>
    %57 = vector.extract_strided_slice %6 {offsets = [0, 88], sizes = [16, 8], strides = [1, 1]} : vector<16x96xf32> to vector<16x8xf32>
    %cst_19 = arith.constant dense<0.000000e+00> : vector<16x16xf32>
    %58 = tpu.matmul %55, %56, %cst_19 {dimension_numbers = #tpu.dot_dimension_numbers<[1], [1], [0], [0], [0, 0, 1, 0], [], []>} : vector<16x8xf32>, vector<16x8xf32>, vector<16x16xf32> -> vector<16x16xf32>
    %59 = arith.addf %58, %1 : vector<16x16xf32>
    %cst_20 = arith.constant dense<0xFF800000> : vector<16xf32>
    %60 = vector.multi_reduction <maximumf>, %59, %cst_20 [1] : vector<16x16xf32> to vector<16xf32>
    %61 = vector.shape_cast %60 : vector<16xf32> to vector<16x1xf32>
    %62 = vector.broadcast %61 : vector<16x1xf32> to vector<16x16xf32>
    %63 = arith.subf %59, %62 : vector<16x16xf32>
    %64 = math.exp %63 : vector<16x16xf32>
    %cst_21 = arith.constant dense<0.000000e+00> : vector<16xf32>
    %65 = vector.multi_reduction <add>, %64, %cst_21 [1] : vector<16x16xf32> to vector<16xf32>
    %66 = vector.shape_cast %65 : vector<16xf32> to vector<16x1xf32>
    %67 = tpu.reciprocal %66 {approx = true} : vector<16x1xf32> -> vector<16x1xf32>
    %68 = vector.broadcast %67 : vector<16x1xf32> to vector<16x16xf32>
    %69 = arith.mulf %64, %68 : vector<16x16xf32>
    %cst_22 = arith.constant dense<0.000000e+00> : vector<16x8xf32>
    %70 = tpu.matmul %69, %57, %cst_22 {dimension_numbers = #tpu.dot_dimension_numbers<[1], [0], [0], [1], [0, 0, 1, 1], [], []>} : vector<16x16xf32>, vector<16x8xf32>, vector<16x8xf32> -> vector<16x8xf32>
    %71 = tpu.concatenate %22, %38, %54, %70 in 1 : vector<16x8xf32>, vector<16x8xf32>, vector<16x8xf32>, vector<16x8xf32> -> vector<16x32xf32>
    %c0_23 = arith.constant 0 : index
    %c0_24 = arith.constant 0 : index
    %72 = vector.load %arg3[%c0_23, %c0_24] : memref<32x32xf32, #tpu.memory_space<vmem>>, vector<32x32xf32>
    %cst_25 = arith.constant dense<0.000000e+00> : vector<16x32xf32>
    %73 = tpu.matmul %71, %72, %cst_25 {dimension_numbers = #tpu.dot_dimension_numbers<[1], [0], [0], [1], [0, 0, 1, 1], [], []>} : vector<16x32xf32>, vector<32x32xf32>, vector<16x32xf32> -> vector<16x32xf32>
    %c0_26 = arith.constant 0 : index
    %c0_27 = arith.constant 0 : index
    %74 = vector.load %arg7[%c0_26, %c0_27] : memref<6x32xf32, #tpu.memory_space<vmem>>, vector<1x32xf32>
    %75 = vector.broadcast %74 : vector<1x32xf32> to vector<16x32xf32>
    %76 = arith.addf %73, %75 : vector<16x32xf32>
    %77 = arith.addf %0, %76 : vector<16x32xf32>
    %cst_28 = arith.constant dense<0.000000e+00> : vector<16xf32>
    %78 = vector.multi_reduction <add>, %77, %cst_28 [1] : vector<16x32xf32> to vector<16xf32>
    %79 = vector.shape_cast %78 : vector<16xf32> to vector<16x1xf32>
    %cst_29 = arith.constant 3.200000e+01 : f32
    %80 = vector.broadcast %cst_29 : f32 to vector<16x1xf32>
    %81 = arith.divf %79, %80 : vector<16x1xf32>
    %82 = vector.broadcast %81 : vector<16x1xf32> to vector<16x32xf32>
    %83 = arith.subf %77, %82 : vector<16x32xf32>
    %84 = arith.mulf %83, %83 : vector<16x32xf32>
    %cst_30 = arith.constant dense<0.000000e+00> : vector<16xf32>
    %85 = vector.multi_reduction <add>, %84, %cst_30 [1] : vector<16x32xf32> to vector<16xf32>
    %86 = vector.shape_cast %85 : vector<16xf32> to vector<16x1xf32>
    %cst_31 = arith.constant 3.200000e+01 : f32
    %87 = vector.broadcast %cst_31 : f32 to vector<16x1xf32>
    %88 = arith.divf %86, %87 : vector<16x1xf32>
    %89 = vector.broadcast %81 : vector<16x1xf32> to vector<16x32xf32>
    %90 = arith.subf %77, %89 : vector<16x32xf32>
    %cst_32 = arith.constant 9.99999974E-6 : f32
    %91 = vector.broadcast %cst_32 : f32 to vector<16x1xf32>
    %92 = arith.addf %88, %91 : vector<16x1xf32>
    %93 = math.rsqrt %92 : vector<16x1xf32>
    %94 = vector.broadcast %93 : vector<16x1xf32> to vector<16x32xf32>
    %95 = arith.mulf %90, %94 : vector<16x32xf32>
    %c1 = arith.constant 1 : index
    %c0_33 = arith.constant 0 : index
    %96 = vector.load %arg7[%c1, %c0_33] : memref<6x32xf32, #tpu.memory_space<vmem>>, vector<1x32xf32>
    %97 = vector.broadcast %96 : vector<1x32xf32> to vector<16x32xf32>
    %98 = arith.mulf %95, %97 : vector<16x32xf32>
    %c2 = arith.constant 2 : index
    %c0_34 = arith.constant 0 : index
    %99 = vector.load %arg7[%c2, %c0_34] : memref<6x32xf32, #tpu.memory_space<vmem>>, vector<1x32xf32>
    %100 = vector.broadcast %99 : vector<1x32xf32> to vector<16x32xf32>
    %101 = arith.addf %98, %100 : vector<16x32xf32>
    %c0_35 = arith.constant 0 : index
    %c0_36 = arith.constant 0 : index
    %102 = vector.load %arg4[%c0_35, %c0_36] : memref<32x64xf32, #tpu.memory_space<vmem>>, vector<32x64xf32>
    %cst_37 = arith.constant dense<0.000000e+00> : vector<16x64xf32>
    %103 = tpu.matmul %101, %102, %cst_37 {dimension_numbers = #tpu.dot_dimension_numbers<[1], [0], [0], [1], [0, 0, 1, 1], [], []>} : vector<16x32xf32>, vector<32x64xf32>, vector<16x64xf32> -> vector<16x64xf32>
    %c0_38 = arith.constant 0 : index
    %c0_39 = arith.constant 0 : index
    %104 = vector.load %arg5[%c0_38, %c0_39] : memref<1x64xf32, #tpu.memory_space<vmem>>, vector<1x64xf32>
    %105 = vector.broadcast %104 : vector<1x64xf32> to vector<16x64xf32>
    %106 = arith.addf %103, %105 : vector<16x64xf32>
    %cst_40 = arith.constant 0.000000e+00 : f32
    %107 = vector.broadcast %cst_40 : f32 to vector<16x64xf32>
    %108 = arith.maximumf %106, %107 : vector<16x64xf32>
    %c0_41 = arith.constant 0 : index
    %c0_42 = arith.constant 0 : index
    %109 = vector.load %arg6[%c0_41, %c0_42] : memref<64x32xf32, #tpu.memory_space<vmem>>, vector<64x32xf32>
    %cst_43 = arith.constant dense<0.000000e+00> : vector<16x32xf32>
    %110 = tpu.matmul %108, %109, %cst_43 {dimension_numbers = #tpu.dot_dimension_numbers<[1], [0], [0], [1], [0, 0, 1, 1], [], []>} : vector<16x64xf32>, vector<64x32xf32>, vector<16x32xf32> -> vector<16x32xf32>
    %c3 = arith.constant 3 : index
    %c0_44 = arith.constant 0 : index
    %111 = vector.load %arg7[%c3, %c0_44] : memref<6x32xf32, #tpu.memory_space<vmem>>, vector<1x32xf32>
    %112 = vector.broadcast %111 : vector<1x32xf32> to vector<16x32xf32>
    %113 = arith.addf %110, %112 : vector<16x32xf32>
    %114 = arith.addf %101, %113 : vector<16x32xf32>
    %cst_45 = arith.constant dense<0.000000e+00> : vector<16xf32>
    %115 = vector.multi_reduction <add>, %114, %cst_45 [1] : vector<16x32xf32> to vector<16xf32>
    %116 = vector.shape_cast %115 : vector<16xf32> to vector<16x1xf32>
    %cst_46 = arith.constant 3.200000e+01 : f32
    %117 = vector.broadcast %cst_46 : f32 to vector<16x1xf32>
    %118 = arith.divf %116, %117 : vector<16x1xf32>
    %119 = vector.broadcast %118 : vector<16x1xf32> to vector<16x32xf32>
    %120 = arith.subf %114, %119 : vector<16x32xf32>
    %121 = arith.mulf %120, %120 : vector<16x32xf32>
    %cst_47 = arith.constant dense<0.000000e+00> : vector<16xf32>
    %122 = vector.multi_reduction <add>, %121, %cst_47 [1] : vector<16x32xf32> to vector<16xf32>
    %123 = vector.shape_cast %122 : vector<16xf32> to vector<16x1xf32>
    %cst_48 = arith.constant 3.200000e+01 : f32
    %124 = vector.broadcast %cst_48 : f32 to vector<16x1xf32>
    %125 = arith.divf %123, %124 : vector<16x1xf32>
    %126 = vector.broadcast %118 : vector<16x1xf32> to vector<16x32xf32>
    %127 = arith.subf %114, %126 : vector<16x32xf32>
    %cst_49 = arith.constant 9.99999974E-6 : f32
    %128 = vector.broadcast %cst_49 : f32 to vector<16x1xf32>
    %129 = arith.addf %125, %128 : vector<16x1xf32>
    %130 = math.rsqrt %129 : vector<16x1xf32>
    %131 = vector.broadcast %130 : vector<16x1xf32> to vector<16x32xf32>
    %132 = arith.mulf %127, %131 : vector<16x32xf32>
    %c4 = arith.constant 4 : index
    %c0_50 = arith.constant 0 : index
    %133 = vector.load %arg7[%c4, %c0_50] : memref<6x32xf32, #tpu.memory_space<vmem>>, vector<1x32xf32>
    %134 = vector.broadcast %133 : vector<1x32xf32> to vector<16x32xf32>
    %135 = arith.mulf %132, %134 : vector<16x32xf32>
    %c5 = arith.constant 5 : index
    %c0_51 = arith.constant 0 : index
    %136 = vector.load %arg7[%c5, %c0_51] : memref<6x32xf32, #tpu.memory_space<vmem>>, vector<1x32xf32>
    %137 = vector.broadcast %136 : vector<1x32xf32> to vector<16x32xf32>
    %138 = arith.addf %135, %137 : vector<16x32xf32>
    %c0_52 = arith.constant 0 : index
    %c0_53 = arith.constant 0 : index
    %139 = vector.load %arg9[%c0_52, %c0_53] : memref<16x32xf32, #tpu.memory_space<vmem>>, vector<16x32xf32>
    tpu.vector_store %arg9[%c0_52, %c0_53], %138 {strides = array<i32>} : memref<16x32xf32, #tpu.memory_space<vmem>>, vector<16x32xf32>,
    return
  }
}

</mosaic_0001>

<bundles_post_ra>
// kernel: tpu_custom_call.1
= control target key start
LH: loop header
LB: loop body
LE: loop exit
PB: predicated region body
PF: predicated region fallthrough
CT: control target
= control target key end

     0   :  { %14 = vsyncpa [#allocation3], 0  ;;  %s2110_s0 = inlined_call_operand.hbm [shape: f32[16,32], index: 0, kind: input, shape index: {}]   ;;  %s2111_s1 = inlined_call_operand.vmem [shape: f32[32,96], index: 1, kind: input, shape index: {}]   ;;  %s2112_s2 = inlined_call_operand.vmem [shape: f32[1,96], index: 2, kind: input, shape index: {}]   ;;  %s2113_s3 = inlined_call_operand.vmem [shape: f32[32,32], index: 3, kind: input, shape index: {}]   ;;  %s2114_s4 = inlined_call_operand.vmem [shape: f32[32,64], index: 4, kind: input, shape index: {}]   ;;  %s2115_s5 = inlined_call_operand.vmem [shape: f32[1,64], index: 5, kind: input, shape index: {}]   ;;  %s2116_s6 = inlined_call_operand.vmem [shape: f32[64,32], index: 6, kind: input, shape index: {}]   ;;  %s2117_s7 = inlined_call_operand.vmem [shape: f32[6,32], index: 7, kind: input, shape index: {}]   ;;  %s2118_s8 = inlined_call_operand.vmem [shape: f32[16,16], index: 8, kind: input, shape index: {}]   ;;  %s2119_s9 = inlined_call_operand.hbm [shape: f32[16,32], index: 9, kind: output, shape index: {}]  }
   0x1   :  { %15 = vsyncpa [#allocation4], 0  ;;  %s1791_s30 = smov [#allocation2]   ;;  %s1743_s13 = scalar_lea.hbm %s2110_s0, 256 }
   0x2   :  { %s21_s10 = sshll.u32 %s1791_s30, 4  ;;  %p1744_p0 = scmp.ne.s32.totalorder %s2110_s0, %s1743_s13  ;;  %s22_s10 = int_to_ptr.vmem [resolvable:$true] %s21_s10 }
   0x3   :  { %p1747_p1 = scmp.lt.u32.totalorder %s1743_s13, %s2110_s0 }
   0x5   :  { %p1749_p2 = pnand %p1747_p1, %p1744_p0 }
   0x7   :  { %1752 = shalt.err (!%p1749_p2)
}
   0x8   :  { %s1753_s18 = scalar_lea.vmem %s22_s10, 256  ;;  %p1758_p4 = scmp.lt.s32.totalorder %s22_s10, %s22_s10 }
   0x9   :  { %p1754_p3 = scmp.ne.s32.totalorder %s22_s10, %s1753_s18  ;;  %p1759_p5 = scmp.lt.s32.totalorder %s1753_s18, %s1753_s18 }
   0xb   :  { %p1760_p6 = por %p1759_p5, %p1758_p4 }
   0xd   :  { %p1761_p7 = pnand %p1760_p6, %p1754_p3 }
   0xf   :  { %1764 = shalt.err (!%p1761_p7)
}
  0x10   :  { %s1792_s19 = smov 128   ;;  %s1793_s20 = smov 8  }
  0x11   :  { %27 = dma.hbm_to_vmem [thread:$0]  %s2110_s0, 256, %s22_s10, [#allocation3], %s1792_s19, %s1792_s19, %s1793_s20  }
  0x12   :  { %1787 = dma.done.wait [#allocation3], 256  }
  0x13   :  { %1788 = vsyncadd [#allocation3], 4294967040  ;;  %vm62_vm0 = vcmask 261120   ;;  %v51_v0 = vld [vmem:[%s2111_s1] sm:$0xff]  ;;  %v52_v1 = vld [vmem:[%s2111_s1 + $0x8] sm:$0xff]  ;;  %vm150_vm1 = vcmask 64512  }
  0x14   :  { %v53_v2 = vld [vmem:[%s2111_s1 + $0x10] sm:$0xff]  ;;  %v1566_v3 = vpack.c.bf16 %v52_v1, %v51_v0  ;;  %v54_v4 = vld [vmem:[%s2111_s1 + $0x18] sm:$0xff]  ;;  %v1885_v5 = vld [vmem:[#allocation2] sm:$0xff]  ;;  %s1794_s1 = smov 120   ;;  %s1795_s11 = smov 96   ;;  %vm234_vm3 = vcmask 130048  }
  0x15   :  { %v1570_v6 = vpack.c.bf16 %v54_v4, %v53_v2  ;;  %1466 = vmatprep.mubr.msk.f32.mxu1 %vm62_vm0, %v1885_v5  ;;  %v1889_v7 = vld [vmem:[#allocation2 + $0x8] sm:$0xff]  ;;  %v1358_v8 = vld [vmem:[%s2112_s2] ss:$0 sm:$0xff]  ;;  %s1796_s2 = smov 88   ;;  %vm1912_vm2 = vmpackc.low %vm150_vm1, %vm150_vm1  ;;  %s1798_s16 = smov 80   ;;  %vm972_vm4 = vcmask 195584  }
  0x16   :  { %1567 = vmatprep.subr.bf16.mxu1 %v1566_v3  ;;  %v1931_v25 = vld [vmem:[%s2118_s8 + $0x8] sm:$0xff]  ;;  %v1936_v26 = vld [vmem:[%s2118_s8] sm:$0xff]  ;;  %s1797_s8 = smov 64   ;;  %s1799_s17 = smov 56   ;;  %vm1215_vm5 = vcmask 523264  }
  0x17   :  { %1569 = vmatpush3.bf16.msra.mxu1 %v1566_v3  ;;  %s1800_s18 = smov 112   ;;  %s1801_s21 = smov 72  }
  0x18   :  { %1571 = vmatprep.subr.bf16.mxu1 %v1570_v6  ;;  %s1802_s22 = smov 104   ;;  %s1803_s23 = smov 48  }
  0x19   :  { %s1804_s24 = smov 40   ;;  %s1805_s25 = smov 16  }
  0x1b   :  { %1573 = vmatpush3.bf16.msra.mxu1 %v1570_v6 }
  0x1e   :  { %1467 = vmatmul.mubr.msk.f32.vlgmr.msra.gmra.mrb[0].mxu1 %vm62_vm0, %v1889_v7 }
  0xf1   :  { %v1468_v9 = vpop.f32.mrb[0].mxu1 }
  0xf2   :  { %v1896_v10 = vadd.f32 %v1468_v9, %v1358_v8  ;;  %v135_v11 = vpop.f32.mrb[1].mxu1 }
  0xf3   :  { %v1898_v12 = vadd.f32 %v1358_v8, %v135_v11 }
  0xf5   :  { %344 = vrot.lane.b32.xlu1 %v1898_v12, %s1794_s1  ;;  %1473 = vmatprep.mubr.msk.f32.mxu1 %vm150_vm1, %v1898_v12  ;;  %v1905_v13 = vpack.i.bf16 %v1896_v10, %v1898_v12 }
  0xf7   :  { %1664 = vrot.lane.b32.xlu0 %v1905_v13, %s1795_s11  ;;  %s1806_s11 = smov 24  }
  0xf9   :  { %346 = vrot.lane.b32.xlu1 %v1896_v10, %s1794_s1 }
  0xfb   :  { %1669 = vrot.lane.b32.xlu0 %v1905_v13, %s1796_s2 }
 0x167   :  { %v345_v23 = vpop.permute.xlu1 %344 }
 0x169   :  { %v1665_v14 = vpop.permute.xlu0 %1664 }
 0x16a   :  { %v1667_v15 = vunpack.i.h.bf16 %v1665_v14  ;;  %v1666_v16 = vunpack.i.l.bf16 %v1665_v14 }
 0x16b   :  { %v347_v24 = vpop.permute.xlu1 %346 }
 0x16c   :  { %v1574_v18 = vpack.c.bf16 %v1667_v15, %v1666_v16 }
 0x16d   :  { %v1670_v19 = vpop.permute.xlu0 %1669 }
 0x16e   :  { %v1672_v20 = vunpack.i.h.bf16 %v1670_v19  ;;  %v1671_v21 = vunpack.i.l.bf16 %v1670_v19  ;;  %1576 = vmatprep.subr.msk.bf16.mxu1 %vm1912_vm2, %v1574_v18 }
 0x16f   :  { %1579 = vmatpush3.bf16.xpose.msk.msra.mxu1 %vm1912_vm2, %v1574_v18 }
 0x170   :  { %v1584_v22 = vpack.c.bf16 %v1672_v20, %v1671_v21 }
 0x172   :  { %1586 = vmatprep.subr.msk.bf16.mxu1 %vm1912_vm2, %v1584_v22 }
 0x176   :  { %1474 = vmatmul.mubr.msk.f32.vlgmr.msra.gmra.mrb[2].mxu1 %vm150_vm1, %v1896_v10 }
 0x177   :  { %1589 = vmatpush3.bf16.xpose.msk.msra.mxu1 %vm1912_vm2, %v1584_v22  ;;  %1487 = vmatprep.mubr.msk.f32.mxu1 %vm150_vm1, %v345_v23 }
 0x17e   :  { %1488 = vmatmul.mubr.msk.f32.vlgmr.msra.gmra.mrb[4].mxu1 %vm150_vm1, %v347_v24 }
 0x249   :  { %v1475_v27 = vpop.f32.mrb[2].mxu1 }
 0x24a   :  { %v231_v28 = vadd.f32 %v1475_v27, %v1931_v25  ;;  %v225_v29 = vpop.f32.mrb[3].mxu1 }
 0x24b   :  { %v226_v30 = vadd.f32 %v225_v29, %v1936_v26 }
 0x24c   :  { %v238_v31 = vsel %vm234_vm3, %v231_v28, -inf }
 0x24d   :  { %239 = vmax.xlane.f32.xlu1 %v238_v31  ;;  %v235_v32 = vsel %vm234_vm3, %v226_v30, -inf }
 0x24e   :  { %236 = vmax.xlane.f32.xlu0 %v235_v32 }
 0x251   :  { %v1489_v33 = vpop.f32.mrb[4].mxu1 }
 0x252   :  { %v426_v34 = vpop.f32.mrb[5].mxu1  ;;  %v432_v36 = vadd.f32 %v1489_v33, %v1931_v25 }
 0x253   :  { %v427_v35 = vadd.f32 %v426_v34, %v1936_v26 }
 0x254   :  { %v438_v38 = vsel %vm234_vm3, %v432_v36, -inf }
 0x255   :  { %v435_v37 = vsel %vm234_vm3, %v427_v35, -inf }
 0x256   :  { %436 = vmax.xlane.f32.xlu0 %v435_v37 }
 0x25a   :  { %439 = vmax.xlane.f32.xlu0 %v438_v38 }
 0x25e   :  { %1674 = vrot.lane.b32.xlu1 %v1905_v13, %s1797_s8 }
 0x2da   :  { %v240_v39 = vpop.xlane.xlu1 %239 }
 0x2db   :  { %v242_v40 = vsub.f32 %v231_v28, %v240_v39  ;;  %v237_v41 = vpop.xlane.xlu0 %236 }
 0x2dc   :  { %v241_v42 = vsub.f32 %v226_v30, %v237_v41 }
 0x2dd   :  { %v245_v43 = vmul.f32 1.442695, %v242_v40 }
 0x2de   :  { %v243_v44 = vmul.f32 1.442695, %v241_v42  ;;  %v1675_v45 = vpop.permute.xlu1 %1674 }
 0x2df   :  { %1703 = vpow2.f32 %v245_v43  ;;  %v1677_v46 = vunpack.i.h.bf16 %v1675_v45  ;;  %v1676_v47 = vunpack.i.l.bf16 %v1675_v45 }
 0x2e0   :  { %1705 = vpow2.f32 %v243_v44 }
 0x2e1   :  { %v1580_v48 = vpack.c.bf16 %v1677_v46, %v1676_v47 }
 0x2e3   :  { %1581 = vmatprep.subr.bf16.mxu0 %v1580_v48  ;;  %v437_v49 = vpop.xlane.xlu0 %436 }
 0x2e4   :  { %1583 = vmatpush3.bf16.msra.mxu0 %v1580_v48  ;;  %v441_v59 = vsub.f32 %v427_v35, %v437_v49 }
 0x2e6   :  { %v443_v60 = vmul.f32 1.442695, %v441_v59 }
 0x2e7   :  { %v440_v50 = vpop.xlane.xlu0 %439 }
 0x2e8   :  { %v442_v51 = vsub.f32 %v432_v36, %v440_v50 }
 0x2e9   :  { %v1704_v52 = vpop.eup %1703 }
 0x2ea   :  { %v1706_v53 = vpop.eup %1705  ;;  %v445_v54 = vmul.f32 1.442695, %v442_v51  ;;  %v250_v55 = vsel %vm234_vm3, %v1704_v52, 0.0 }
 0x2eb   :  { %251 = vadd.xlane.f32.xlu0 %v250_v55  ;;  %v247_v56 = vsel %vm234_vm3, %v1706_v53, 0.0 }
 0x2ec   :  { %1707 = vpow2.f32 %v445_v54  ;;  %248 = vadd.xlane.f32.xlu1 %v247_v56 }
 0x2ed   :  { %1709 = vpow2.f32 %v443_v60 }
 0x2f6   :  { %v1708_v57 = vpop.eup %1707 }
 0x2f7   :  { %v450_v58 = vsel %vm234_vm3, %v1708_v57, 0.0  ;;  %v1710_v61 = vpop.eup %1709 }
 0x2f8   :  { %451 = vadd.xlane.f32.xlu0 %v450_v58  ;;  %v447_v62 = vsel %vm234_vm3, %v1710_v61, 0.0 }
 0x2fd   :  { %1684 = vrot.lane.b32.xlu1 %v1905_v13, %s1798_s16 }
 0x30e   :  { %1679 = vrot.lane.b32.xlu0 %v1905_v13, %s1799_s17 }
 0x312   :  { %546 = vrot.lane.b32.xlu0 %v1896_v10, %s1800_s18 }
 0x321   :  { %448 = vadd.xlane.f32.xlu1 %v447_v62 }
 0x332   :  { %544 = vrot.lane.b32.xlu1 %v1898_v12, %s1800_s18 }
 0x378   :  { %v252_v63 = vpop.xlane.xlu0 %251 }
 0x379   :  { %1711 = vrcp.f32 %v252_v63  ;;  %v249_v0 = vpop.xlane.xlu1 %248 }
 0x37a   :  { %1713 = vrcp.f32 %v249_v0 }
 0x37d   :  { %v1685_v8 = vpop.permute.xlu1 %1684 }
 0x37e   :  { %v1687_v11 = vunpack.i.h.bf16 %v1685_v8  ;;  %v1686_v14 = vunpack.i.l.bf16 %v1685_v8 }
 0x380   :  { %v1594_v19 = vpack.c.bf16 %v1687_v11, %v1686_v14 }
 0x383   :  { %v1712_v1 = vpop.eup %1711 }
 0x384   :  { %v1714_v2 = vpop.eup %1713  ;;  %v256_v6 = vmul.f32 %v1712_v1, %v1704_v52 }
 0x385   :  { %v452_v3 = vpop.xlane.xlu0 %451  ;;  %v255_v4 = vmul.f32 %v1714_v2, %v1706_v53 }
 0x386   :  { %1715 = vrcp.f32 %v452_v3 }
 0x387   :  { %1480 = vmatprep.mubr.msk.f32.mxu0 %vm234_vm3, %v255_v4 }
 0x388   :  { %1481 = vmatmul.mubr.msk.f32.vlgmr.msra.gmra.mrb[0].mxu0 %vm234_vm3, %v256_v6 }
 0x389   :  { %v1680_v9 = vpop.permute.xlu0 %1679 }
 0x38a   :  { %v1682_v15 = vunpack.i.h.bf16 %v1680_v9  ;;  %v1681_v16 = vunpack.i.l.bf16 %v1680_v9 }
 0x38c   :  { %v1590_v18 = vpack.c.bf16 %v1682_v15, %v1681_v16 }
 0x38d   :  { %v547_v28 = vpop.permute.xlu0 %546 }
 0x38e   :  { %1591 = vmatprep.subr.bf16.mxu0 %v1590_v18 }
 0x38f   :  { %1593 = vmatpush3.bf16.msra.mxu0 %v1590_v18 }
 0x390   :  { %1596 = vmatprep.subr.msk.bf16.mxu0 %vm1912_vm2, %v1594_v19  ;;  %v1716_v21 = vpop.eup %1715 }
 0x391   :  { %v456_v24 = vmul.f32 %v1716_v21, %v1708_v57 }
 0x3ae   :  { %v449_v20 = vpop.xlane.xlu1 %448 }
 0x3af   :  { %1717 = vrcp.f32 %v449_v20 }
 0x3b2   :  { %v545_v27 = vpop.permute.xlu1 %544 }
 0x3b9   :  { %v1718_v22 = vpop.eup %1717 }
 0x3ba   :  { %v455_v23 = vmul.f32 %v1718_v22, %v1710_v61 }
 0x3bc   :  { %1494 = vmatprep.mubr.msk.f32.mxu0 %vm234_vm3, %v455_v23 }
 0x3bd   :  { %1495 = vmatmul.mubr.msk.f32.vlgmr.msra.gmra.mrb[2].mxu0 %vm234_vm3, %v456_v24 }
 0x3be   :  { %1599 = vmatpush3.bf16.xpose.msk.msra.mxu0 %vm1912_vm2, %v1594_v19  ;;  %1501 = vmatprep.mubr.msk.f32.mxu0 %vm150_vm1, %v545_v27 }
 0x3c5   :  { %1502 = vmatmul.mubr.msk.f32.vlgmr.msra.gmra.mrb[4].mxu0 %vm150_vm1, %v547_v28 }
 0x45b   :  { %v1965_v29 = vpop.f32.mrb[0].mxu0 }
 0x45c   :  { %v1967_v30 = vpop.f32.mrb[1].mxu0 }
 0x490   :  { %v1969_v31 = vpop.f32.mrb[2].mxu0 }
 0x491   :  { %v1971_v32 = vpop.f32.mrb[3].mxu0 }
 0x498   :  { %v1503_v33 = vpop.f32.mrb[4].mxu0 }
 0x499   :  { %v632_v34 = vadd.f32 %v1503_v33, %v1931_v25  ;;  %v626_v35 = vpop.f32.mrb[5].mxu0 }
 0x49a   :  { %v627_v36 = vadd.f32 %v626_v35, %v1936_v26  ;;  %v977_v35 = vld [vmem:[%s2113_s3 + $0x10] sm:$0xff] }
 0x49b   :  { %v638_v37 = vsel %vm234_vm3, %v632_v34, -inf }
 0x49c   :  { %639 = vmax.xlane.f32.xlu0 %v638_v37  ;;  %v635_v38 = vsel %vm234_vm3, %v627_v36, -inf  ;;  %v978_v37 = vld [vmem:[%s2113_s3 + $0x18] sm:$0xff] }
 0x49d   :  { %636 = vmax.xlane.f32.xlu1 %v635_v38  ;;  %v1618_v38 = vpack.c.bf16 %v978_v37, %v977_v35 }
 0x529   :  { %v640_v39 = vpop.xlane.xlu0 %639 }
 0x52a   :  { %v642_v40 = vsub.f32 %v632_v34, %v640_v39  ;;  %v637_v41 = vpop.xlane.xlu1 %636  ;;  %v976_v34 = vld [vmem:[%s2113_s3 + $0x8] sm:$0xff] }
 0x52b   :  { %v641_v42 = vsub.f32 %v627_v36, %v637_v41 }
 0x52c   :  { %v645_v43 = vmul.f32 1.442695, %v642_v40 }
 0x52d   :  { %v643_v44 = vmul.f32 1.442695, %v641_v42 }
 0x52e   :  { %1719 = vpow2.f32 %v645_v43 }
 0x52f   :  { %1721 = vpow2.f32 %v643_v44 }
 0x538   :  { %v1720_v45 = vpop.eup %1719 }
 0x539   :  { %v1722_v46 = vpop.eup %1721  ;;  %v650_v47 = vsel %vm234_vm3, %v1720_v45, 0.0 }
 0x53a   :  { %651 = vadd.xlane.f32.xlu1 %v650_v47  ;;  %v647_v48 = vsel %vm234_vm3, %v1722_v46, 0.0 }
 0x53b   :  { %648 = vadd.xlane.f32.xlu0 %v647_v48 }
 0x54b   :  { %1694 = vrot.lane.b32.xlu1 %v1905_v13, %s1801_s21 }
 0x54f   :  { %744 = vrot.lane.b32.xlu1 %v1898_v12, %s1802_s22 }
 0x551   :  { %1689 = vrot.lane.b32.xlu0 %v1905_v13, %s1803_s23 }
 0x555   :  { %746 = vrot.lane.b32.xlu0 %v1896_v10, %s1802_s22  ;;  %s1807_s22 = smov [#allocation5]  }
 0x556   :  { %s1346_s23 = sshll.u32 %s1807_s22, 4  ;;  %s1347_s23 = int_to_ptr.vmem [resolvable:$true] %s1346_s23 }
 0x557   :  { %p1770_p9 = scmp.lt.s32.totalorder %s1347_s23, %s1347_s23 }
 0x5c7   :  { %v652_v49 = vpop.xlane.xlu1 %651 }
 0x5c8   :  { %1723 = vrcp.f32 %v652_v49  ;;  %v649_v50 = vpop.xlane.xlu0 %648 }
 0x5c9   :  { %1725 = vrcp.f32 %v649_v50 }
 0x5cb   :  { %v1695_v51 = vpop.permute.xlu1 %1694 }
 0x5cc   :  { %v1690_v52 = vpop.permute.xlu0 %1689  ;;  %v1697_v53 = vunpack.i.h.bf16 %v1695_v51  ;;  %v1696_v54 = vunpack.i.l.bf16 %v1695_v51 }
 0x5cd   :  { %v1692_v55 = vunpack.i.h.bf16 %v1690_v52  ;;  %v1691_v56 = vunpack.i.l.bf16 %v1690_v52 }
 0x5ce   :  { %v1604_v58 = vpack.c.bf16 %v1697_v53, %v1696_v54  ;;  %v1385_v53 = vld [vmem:[%s2117_s7] ss:$0 sm:$0xff] }
 0x5cf   :  { %v1600_v57 = vpack.c.bf16 %v1692_v55, %v1691_v56  ;;  %v745_v61 = vpop.permute.xlu1 %744 }
 0x5d0   :  { %v747_v62 = vpop.permute.xlu0 %746 }
 0x5d1   :  { %1601 = vmatprep.subr.bf16.mxu1 %v1600_v57 }
 0x5d2   :  { %v1724_v59 = vpop.eup %1723  ;;  %1603 = vmatpush3.bf16.msra.mxu1 %v1600_v57 }
 0x5d3   :  { %v1726_v12 = vpop.eup %1725  ;;  %1606 = vmatprep.subr.msk.bf16.mxu1 %vm1912_vm2, %v1604_v58  ;;  %v656_v60 = vmul.f32 %v1724_v59, %v1720_v45 }
 0x5d4   :  { %v655_v10 = vmul.f32 %v1726_v12, %v1722_v46 }
 0x5d6   :  { %1508 = vmatprep.mubr.msk.f32.mxu1 %vm234_vm3, %v655_v10 }
 0x5d7   :  { %1509 = vmatmul.mubr.msk.f32.vlgmr.msra.gmra.mrb[6].mxu1 %vm234_vm3, %v656_v60 }
 0x5d8   :  { %1515 = vmatprep.mubr.msk.f32.mxu1 %vm150_vm1, %v745_v61 }
 0x5db   :  { %1609 = vmatpush3.bf16.xpose.msk.msra.mxu1 %vm1912_vm2, %v1604_v58 }
 0x5e2   :  { %1516 = vmatmul.mubr.msk.f32.vlgmr.msra.gmra.mrb[8].mxu1 %vm150_vm1, %v747_v62 }
 0x6aa   :  { %v1510_v63 = vpop.f32.mrb[6].mxu1 }
 0x6ab   :  { %v735_v0 = vpop.f32.mrb[7].mxu1 }
 0x6b5   :  { %v1517_v1 = vpop.f32.mrb[8].mxu1 }
 0x6b6   :  { %v832_v2 = vadd.f32 %v1517_v1, %v1931_v25  ;;  %v826_v3 = vpop.f32.mrb[9].mxu1 }
 0x6b7   :  { %v827_v4 = vadd.f32 %v826_v3, %v1936_v26  ;;  %v1109_v3 = vld [vmem:[%s2114_s4 + $0x8] sm:$0xff] }
 0x6b8   :  { %v838_v6 = vsel %vm234_vm3, %v832_v2, -inf }
 0x6b9   :  { %839 = vmax.xlane.f32.xlu0 %v838_v6  ;;  %v835_v8 = vsel %vm234_vm3, %v827_v4, -inf  ;;  %v1110_v6 = vld [vmem:[%s2114_s4 + $0x10] sm:$0xff] }
 0x6ba   :  { %836 = vmax.xlane.f32.xlu1 %v835_v8  ;;  %v1111_v8 = vld [vmem:[%s2114_s4 + $0x18] sm:$0xff] }
 0x746   :  { %v840_v9 = vpop.xlane.xlu0 %839 }
 0x747   :  { %v842_v17 = vsub.f32 %v832_v2, %v840_v9  ;;  %v837_v11 = vpop.xlane.xlu1 %836  ;;  %v1626_v9 = vpack.c.bf16 %v1111_v8, %v1110_v6  ;;  %v1396_v6 = vld [vmem:[%s2117_s7 + $0x4] ss:$0 sm:$0xff] }
 0x748   :  { %v841_v14 = vsub.f32 %v827_v4, %v837_v11  ;;  %v1203_v11 = vld [vmem:[%s2116_s6 + $0x8] sm:$0xff] }
 0x749   :  { %v845_v15 = vmul.f32 1.442695, %v842_v17  ;;  %v1202_v17 = vld [vmem:[%s2116_s6] sm:$0xff] }
 0x74a   :  { %v843_v16 = vmul.f32 1.442695, %v841_v14  ;;  %v1204_v14 = vld [vmem:[%s2116_s6 + $0x10] sm:$0xff] }
 0x74b   :  { %1727 = vpow2.f32 %v845_v15  ;;  %v1630_v15 = vpack.c.bf16 %v1203_v11, %v1202_v17  ;;  %v1397_v11 = vld [vmem:[%s2117_s7 + $0x5] ss:$0 sm:$0xff] }
 0x74c   :  { %1729 = vpow2.f32 %v843_v16  ;;  %v1205_v16 = vld [vmem:[%s2116_s6 + $0x18] sm:$0xff] }
 0x755   :  { %v1728_v18 = vpop.eup %1727 }
 0x756   :  { %v1730_v19 = vpop.eup %1729  ;;  %v850_v25 = vsel %vm234_vm3, %v1728_v18, 0.0 }
 0x757   :  { %851 = vadd.xlane.f32.xlu1 %v850_v25  ;;  %v847_v26 = vsel %vm234_vm3, %v1730_v19, 0.0  ;;  %v1207_v25 = vld [vmem:[%s2116_s6 + $0x28] sm:$0xff] }
 0x758   :  { %848 = vadd.xlane.f32.xlu0 %v847_v26 }
 0x768   :  { %946 = vrot.lane.b32.xlu1 %v1971_v32, %s1793_s20 }
 0x76c   :  { %948 = vrot.lane.b32.xlu1 %v1969_v31, %s1793_s20 }
 0x76e   :  { %1699 = vrot.lane.b32.xlu0 %v1905_v13, %s1804_s24  ;;  %v975_v13 = vld [vmem:[%s2113_s3] sm:$0xff]  ;;  %s1765_s24 = scalar_lea.vmem %s1347_s23, 256 }
 0x76f   :  { %v1614_v36 = vpack.c.bf16 %v976_v34, %v975_v13  ;;  %p1766_p8 = scmp.ne.s32.totalorder %s1347_s23, %s1765_s24  ;;  %p1771_p10 = scmp.lt.s32.totalorder %s1765_s24, %s1765_s24 }
 0x770   :  { %956 = vrot.lane.b32.xlu1 %v1510_v63, %s1805_s25 }
 0x771   :  { %p1772_p11 = por %p1771_p10, %p1770_p9 }
 0x772   :  { %954 = vrot.lane.b32.xlu0 %v735_v0, %s1805_s25 }
 0x773   :  { %p1773_p12 = pnand %p1772_p11, %p1766_p8 }
 0x7e4   :  { %v852_v20 = vpop.xlane.xlu1 %851 }
 0x7e5   :  { %1731 = vrcp.f32 %v852_v20  ;;  %v849_v21 = vpop.xlane.xlu0 %848 }
 0x7e6   :  { %1733 = vrcp.f32 %v849_v21 }
 0x7e8   :  { %v947_v41 = vpop.permute.xlu1 %946 }
 0x7e9   :  { %v1700_v22 = vpop.permute.xlu0 %1699  ;;  %v968_v45 = vsel %vm150_vm1, %v1967_v30, %v947_v41 }
 0x7ea   :  { %v1702_v23 = vunpack.i.h.bf16 %v1700_v22  ;;  %v1701_v24 = vunpack.i.l.bf16 %v1700_v22 }
 0x7ec   :  { %v1610_v27 = vpack.c.bf16 %v1702_v23, %v1701_v24  ;;  %v949_v42 = vpop.permute.xlu1 %948 }
 0x7ed   :  { %v955_v44 = vpop.permute.xlu0 %954  ;;  %v969_v47 = vsel %vm150_vm1, %v1965_v29, %v949_v42  ;;  %v1390_v42 = vld [vmem:[%s2115_s5] ss:$0 sm:$0xff] }
 0x7ee   :  { %1611 = vmatprep.subr.bf16.mxu0 %v1610_v27  ;;  %v970_v48 = vsel %vm234_vm3, %v968_v45, %v955_v44 }
 0x7ef   :  { %v1732_v28 = vpop.eup %1731  ;;  %1613 = vmatpush3.bf16.msra.mxu0 %v1610_v27 }
 0x7f0   :  { %v1734_v32 = vpop.eup %1733  ;;  %v856_v31 = vmul.f32 %v1732_v28, %v1728_v18  ;;  %1615 = vmatprep.subr.bf16.mxu0 %v1614_v36  ;;  %v957_v43 = vpop.permute.xlu1 %956  ;;  %v1634_v18 = vpack.c.bf16 %v1205_v16, %v1204_v14 }
 0x7f1   :  { %v855_v33 = vmul.f32 %v1734_v32, %v1730_v19  ;;  %v971_v50 = vsel %vm234_vm3, %v969_v47, %v957_v43  ;;  %v1206_v19 = vld [vmem:[%s2116_s6 + $0x20] sm:$0xff] }
 0x7f2   :  { %v1638_v26 = vpack.c.bf16 %v1207_v25, %v1206_v19  ;;  %v1388_v32 = vld [vmem:[%s2117_s7 + $0x1] ss:$0 sm:$0xff] }
 0x7f3   :  { %1522 = vmatprep.mubr.msk.f32.mxu0 %vm234_vm3, %v855_v33 }
 0x7f4   :  { %1523 = vmatmul.mubr.msk.f32.vlgmr.msra.gmra.mrb[6].mxu0 %vm234_vm3, %v856_v31  ;;  %v1389_v31 = vld [vmem:[%s2117_s7 + $0x2] ss:$0 sm:$0xff] }
 0x7f5   :  { %1617 = vmatpush3.bf16.msra.mxu0 %v1614_v36 }
 0x7f6   :  { %1619 = vmatprep.subr.bf16.mxu0 %v1618_v38 }
 0x7f9   :  { %1621 = vmatpush3.bf16.msra.mxu0 %v1618_v38 }
 0x7fa   :  { %1631 = vmatprep.subr.bf16.mxu0 %v1630_v15 }
 0x8c7   :  { %v1524_v39 = vpop.f32.mrb[6].mxu0 }
 0x8c8   :  { %964 = vrot.lane.b32.xlu1 %v1524_v39, %s1806_s11  ;;  %v935_v40 = vpop.f32.mrb[7].mxu0  ;;  %v1208_v39 = vld [vmem:[%s2116_s6 + $0x30] sm:$0xff] }
 0x8c9   :  { %962 = vrot.lane.b32.xlu0 %v935_v40, %s1806_s11  ;;  %v1209_v40 = vld [vmem:[%s2116_s6 + $0x38] sm:$0xff] }
 0x8ca   :  { %v1642_v41 = vpack.c.bf16 %v1209_v40, %v1208_v39 }
 0x93a   :  { %v965_v46 = vpop.permute.xlu1 %964 }
 0x93b   :  { %v963_v49 = vpop.permute.xlu0 %962  ;;  %v974_v52 = vsel %vm972_vm4, %v971_v50, %v965_v46 }
 0x93c   :  { %v973_v51 = vsel %vm972_vm4, %v970_v48, %v963_v49  ;;  %v1393_v49 = vld [vmem:[%s2117_s7 + $0x3] ss:$0 sm:$0xff] }
 0x93d   :  { %1533 = vmatprep.mubr.msk.f32.mxu0 %vm62_vm0, %v973_v51 }
 0x93e   :  { %1534 = vmatmul.mubr.msk.f32.vlgmr.msra.gmra.mrb[8].mxu0 %vm62_vm0, %v974_v52 }
 0x93f   :  { %1633 = vmatpush3.bf16.msra.mxu0 %v1630_v15 }
 0x940   :  { %1635 = vmatprep.subr.bf16.mxu0 %v1634_v18 }
 0x943   :  { %1637 = vmatpush3.bf16.msra.mxu0 %v1634_v18 }
 0x944   :  { %1639 = vmatprep.subr.bf16.mxu0 %v1638_v26 }
 0x947   :  { %1641 = vmatpush3.bf16.msra.mxu0 %v1638_v26 }
 0x948   :  { %1643 = vmatprep.subr.bf16.mxu0 %v1642_v41 }
 0x94b   :  { %1645 = vmatpush3.bf16.msra.mxu0 %v1642_v41 }
 0xa11   :  { %v1535_v30 = vpop.f32.mrb[8].mxu0 }
 0xa12   :  { %v1062_v54 = vadd.f32 %v1535_v30, %v1385_v53  ;;  %v1056_v55 = vpop.f32.mrb[9].mxu0 }
 0xa13   :  { %v1057_v56 = vadd.f32 %v1385_v53, %v1056_v55 }
 0xa14   :  { %v1066_v29 = vadd.f32 %v1062_v54, %v1889_v7 }
 0xa15   :  { %v1065_v57 = vadd.f32 %v1057_v56, %v1885_v5  ;;  %v1108_v5 = vld [vmem:[%s2114_s4] sm:$0xff] }
 0xa16   :  { %v1070_v58 = vsel %vm62_vm0, %v1066_v29, 0.0  ;;  %v1622_v4 = vpack.c.bf16 %v1109_v3, %v1108_v5 }
 0xa17   :  { %1071 = vadd.xlane.f32.xlu1 %v1070_v58  ;;  %v1067_v59 = vsel %vm62_vm0, %v1065_v57, 0.0 }
 0xa18   :  { %1068 = vadd.xlane.f32.xlu0 %v1067_v59  ;;  %1623 = vmatprep.subr.bf16.mxu1 %v1622_v4 }
 0xa19   :  { %1625 = vmatpush3.bf16.msra.mxu1 %v1622_v4 }
 0xa1a   :  { %1627 = vmatprep.subr.bf16.mxu1 %v1626_v9 }
 0xa1d   :  { %1629 = vmatpush3.bf16.msra.mxu1 %v1626_v9 }
 0xaa4   :  { %v1072_v12 = vpop.xlane.xlu1 %1071 }
 0xaa5   :  { %v1075_v10 = vmul.f32 0.03125, %v1072_v12  ;;  %v1069_v60 = vpop.xlane.xlu0 %1068 }
 0xaa6   :  { %v1074_v61 = vmul.f32 0.03125, %v1069_v60 }
 0xaa7   :  { %v1077_v62 = vsub.f32 %v1066_v29, %v1075_v10 }
 0xaa8   :  { %v1076_v63 = vsub.f32 %v1065_v57, %v1074_v61 }
 0xaa9   :  { %v1079_v2 = vmul.f32 %v1077_v62, %v1077_v62 }
 0xaaa   :  { %v1078_v0 = vmul.f32 %v1076_v63, %v1076_v63 }
 0xaab   :  { %v1083_v7 = vsel %vm62_vm0, %v1079_v2, 0.0 }
 0xaac   :  { %v1080_v1 = vsel %vm62_vm0, %v1078_v0, 0.0 }
 0xaad   :  { %1081 = vadd.xlane.f32.xlu0 %v1080_v1 }
 0xab1   :  { %1084 = vadd.xlane.f32.xlu0 %v1083_v7 }
 0xb3a   :  { %v1082_v20 = vpop.xlane.xlu0 %1081 }
 0xb3b   :  { %v1086_v21 = vmul.f32 0.03125, %v1082_v20 }
 0xb3d   :  { %v1088_v22 = vadd.f32 1e-05, %v1086_v21 }
 0xb3e   :  { %v1085_v23 = vpop.xlane.xlu0 %1084 }
 0xb3f   :  { %1735 = vrsqrt.f32 %v1088_v22  ;;  %v1087_v24 = vmul.f32 0.03125, %v1085_v23 }
 0xb41   :  { %v1089_v27 = vadd.f32 1e-05, %v1087_v24 }
 0xb43   :  { %1737 = vrsqrt.f32 %v1089_v27 }
 0xb49   :  { %v1736_v28 = vpop.eup %1735 }
 0xb4a   :  { %v1092_v33 = vmul.f32 %v1736_v28, %v1076_v63 }
 0xb4c   :  { %v1099_v13 = vmul.f32 %v1388_v32, %v1092_v33 }
 0xb4d   :  { %v1738_v34 = vpop.eup %1737 }
 0xb4e   :  { %v1093_v35 = vmul.f32 %v1738_v34, %v1077_v62  ;;  %v1106_v36 = vadd.f32 %v1389_v31, %v1099_v13 }
 0xb50   :  { %v1100_v37 = vmul.f32 %v1388_v32, %v1093_v35  ;;  %1544 = vmatprep.mubr.msk.f32.mxu1 %vm62_vm0, %v1106_v36 }
 0xb52   :  { %v1107_v38 = vadd.f32 %v1389_v31, %v1100_v37 }
 0xb54   :  { %1545 = vmatmul.mubr.msk.f32.vlgmr.msra.gmra.mrb[10].mxu1 %vm62_vm0, %v1107_v38 }
 0xc27   :  { %v1546_v43 = vpop.f32.mrb[10].mxu1 }
 0xc28   :  { %v1197_v44 = vadd.f32 %v1546_v43, %v1390_v42  ;;  %v1191_v45 = vpop.f32.mrb[11].mxu1 }
 0xc29   :  { %v1192_v46 = vadd.f32 %v1390_v42, %v1191_v45 }
 0xc2a   :  { %v1201_v48 = vmax.f32 %v1197_v44, 0.0 }
 0xc2b   :  { %v1200_v47 = vmax.f32 %v1192_v46, 0.0 }
 0xc2d   :  { %1563 = vmatprep.mubr.msk.f32.mxu0 %vm1215_vm5, %v1200_v47 }
 0xc2e   :  { %1564 = vmatmul.mubr.msk.f32.vlgmr.msra.gmra.mrb[10].mxu0 %vm1215_vm5, %v1201_v48 }
 0xd01   :  { %v1565_v50 = vpop.f32.mrb[10].mxu0 }
 0xd02   :  { %v1294_v51 = vadd.f32 %v1565_v50, %v1393_v49  ;;  %v1288_v52 = vpop.f32.mrb[11].mxu0 }
 0xd03   :  { %v1289_v53 = vadd.f32 %v1393_v49, %v1288_v52 }
 0xd04   :  { %v1298_v30 = vadd.f32 %v1294_v51, %v1107_v38 }
 0xd05   :  { %v1297_v54 = vadd.f32 %v1289_v53, %v1106_v36 }
 0xd06   :  { %v1302_v55 = vsel %vm62_vm0, %v1298_v30, 0.0 }
 0xd07   :  { %1303 = vadd.xlane.f32.xlu0 %v1302_v55  ;;  %v1299_v56 = vsel %vm62_vm0, %v1297_v54, 0.0 }
 0xd08   :  { %1300 = vadd.xlane.f32.xlu1 %v1299_v56 }
 0xd94   :  { %v1304_v29 = vpop.xlane.xlu0 %1303 }
 0xd95   :  { %v1306_v57 = vmul.f32 0.03125, %v1304_v29  ;;  %v1301_v58 = vpop.xlane.xlu1 %1300 }
 0xd96   :  { %v1305_v59 = vmul.f32 0.03125, %v1301_v58 }
 0xd97   :  { %v1308_v12 = vsub.f32 %v1298_v30, %v1306_v57 }
 0xd98   :  { %v1307_v10 = vsub.f32 %v1297_v54, %v1305_v59 }
 0xd99   :  { %v1310_v60 = vmul.f32 %v1308_v12, %v1308_v12 }
 0xd9a   :  { %v1309_v61 = vmul.f32 %v1307_v10, %v1307_v10 }
 0xd9b   :  { %v1314_v62 = vsel %vm62_vm0, %v1310_v60, 0.0 }
 0xd9c   :  { %1315 = vadd.xlane.f32.xlu0 %v1314_v62  ;;  %v1311_v63 = vsel %vm62_vm0, %v1309_v61, 0.0 }
 0xd9d   :  { %1312 = vadd.xlane.f32.xlu1 %v1311_v63 }
 0xe29   :  { %v1316_v0 = vpop.xlane.xlu0 %1315 }
 0xe2a   :  { %v1318_v1 = vmul.f32 0.03125, %v1316_v0  ;;  %v1313_v2 = vpop.xlane.xlu1 %1312 }
 0xe2b   :  { %v1317_v7 = vmul.f32 0.03125, %v1313_v2 }
 0xe2c   :  { %v1320_v5 = vadd.f32 1e-05, %v1318_v1 }
 0xe2d   :  { %v1319_v3 = vadd.f32 1e-05, %v1317_v7 }
 0xe2e   :  { %1739 = vrsqrt.f32 %v1320_v5 }
 0xe2f   :  { %1741 = vrsqrt.f32 %v1319_v3 }
 0xe38   :  { %v1740_v4 = vpop.eup %1739 }
 0xe39   :  { %v1742_v8 = vpop.eup %1741  ;;  %v1324_v9 = vmul.f32 %v1740_v4, %v1308_v12 }
 0xe3a   :  { %v1323_v17 = vmul.f32 %v1742_v8, %v1307_v10 }
 0xe3b   :  { %v1331_v14 = vmul.f32 %v1396_v6, %v1324_v9 }
 0xe3c   :  { %v1330_v15 = vmul.f32 %v1396_v6, %v1323_v17 }
 0xe3d   :  { %v1338_v16 = vadd.f32 %v1397_v11, %v1331_v14 }
 0xe3e   :  { %v1337_v18 = vadd.f32 %v1397_v11, %v1330_v15 }
 0xe3f   :  { %1340 = vst.msk [vmem:[#allocation5 + $0x8] sm:$0xff] %vm62_vm0, %v1338_v16 }
 0xe40   :  { %1339 = vst.msk [vmem:[#allocation5] sm:$0xff] %vm62_vm0, %v1337_v18 }
 0xe41   :  { %1776 = shalt.err (!%p1773_p12)
}
 0xe42   :  { %s1777_s26 = scalar_lea.hbm %s2119_s9, 256 }
 0xe43   :  { %p1778_p13 = scmp.ne.s32.totalorder %s2119_s9, %s1777_s26  ;;  %p1781_p0 = scmp.lt.u32.totalorder %s1777_s26, %s2119_s9 }
 0xe45   :  { %p1783_p1 = pnand %p1781_p0, %p1778_p13 }
 0xe47   :  { %1786 = shalt.err (!%p1783_p1)
}
 0xe48   :  { %1352 = dma.vmem_to_hbm [thread:$0]  %s1347_s23, 256, %s2119_s9, [#allocation4], %s1792_s19, %s1792_s19, %s1793_s20  }
 0xe49   :  { %1789 = dma.done.wait [#allocation4], 256  }
 0xe4a   :  { %1790 = vsyncadd [#allocation4], 4294967040 }
 0xe4b   :  { %1356 = vsyncpa [#allocation3], 1 }
 0xe4c   :  { %1357 = vsyncpa [#allocation4], 1 }

</bundles_post_ra>
